<compile_context>
chip_gen: v5e
topology: v5e:2x2
jax: 0.10.0
libtpu: 0.0.40
codegen_flags: <defaults>
</compile_context>

<pallas_src>
import functools

import jax
import jax.numpy as jnp
from jax import lax
from jax.experimental import pallas as pl
from jax.experimental.pallas import tpu as pltpu

SUBLANE = 8
LANE = 128


def _round_up(x, m):
    return ((x + m - 1) // m) * m


def rnn_classify_kernel(tok_ref, emb_proj_ref, w_hh_ref, cls_ref, out_ref):
    """Fused embedding-gather + input-projection + Elman RNN + classifier.

    tok_ref      : (S*Bp, 1) int32    time-major flattened tokens (row = t*Bp + b)
    emb_proj_ref : (Vp, D)  f32/bf16  embedding @ W_ih^T + (b_ih + b_hh), pre-folded
    w_hh_ref     : (D, D)   f32/bf16  W_hh^T
    cls_ref      : (D+1, Cp) f32/bf16 rows 0..D-1 = W_cls^T (lane-padded), row D = b_cls
    out_ref      : (Bp, Cp) f32       lane-dense logits
    """
    SB = tok_ref.shape[0]
    Vp, D = emb_proj_ref.shape
    Bp = out_ref.shape[0]
    S = SB // Bp
    p_dt = emb_proj_ref.dtype          # f32 on v5e, bf16 on v6e/v7x

    # Embedding gather + hoisted input projection as ONE one-hot matmul on the MXU.
    # (Each one-hot row sums to exactly 1, so the bias fold into emb_proj is exact.
    #  Out-of-range tokens produce an all-zero row instead of raising like PyTorch.)
    tok = tok_ref[...]                                              # (SB, 1) int32
    vocab_iota = lax.broadcasted_iota(jnp.int32, (SB, Vp), 1)       # (SB, Vp)
    onehot = (tok == vocab_iota).astype(p_dt)                       # 0/1 exact in bf16
    pre = jnp.dot(onehot, emb_proj_ref[...],
                  preferred_element_type=jnp.float32)               # (SB, D) f32

    # Recurrence, fully unrolled (S static): 1 matmul + add + tanh per step.
    # Activations and tanh stay f32 (v5e VPU/EUP have no bf16); only MXU operands
    # are cast to the parameter dtype.
    w_hh = w_hh_ref[...]
    h = jnp.tanh(pre[0:Bp, :])                                      # h_{-1}=0 -> skip h@W_hh
    for t in range(1, S):
        h = jnp.tanh(pre[t * Bp:(t + 1) * Bp, :]
                     + jnp.dot(h.astype(p_dt), w_hh,
                               preferred_element_type=jnp.float32))

    # Classifier from the packed (W_cls^T | b_cls) buffer, lane-dense (Bp, Cp) store.
    w_cls = cls_ref[0:D, :]
    b_cls = cls_ref[D:D + 1, :].astype(jnp.float32)
    logits = jnp.dot(h.astype(p_dt), w_cls,
                     preferred_element_type=jnp.float32) + b_cls
    out_ref[...] = logits.astype(out_ref.dtype)


def init_params(key, vocab_size, vector_dim, sentence_length):
    """Raw (unpadded) parameters, mirroring the PyTorch module layout."""
    D = vector_dim
    C = sentence_length + 1
    ks = jax.random.split(key, 7)
    scale = 0.1
    emb = scale * jax.random.normal(ks[0], (vocab_size, D), jnp.float32)
    emb = emb.at[0].set(0.0)                                        # padding_idx=0
    w_ih = scale * jax.random.normal(ks[1], (D, D), jnp.float32)    # PyTorch (out, in)
    w_hh = scale * jax.random.normal(ks[2], (D, D), jnp.float32)
    b_ih = scale * jax.random.normal(ks[3], (D,), jnp.float32)
    b_hh = scale * jax.random.normal(ks[4], (D,), jnp.float32)
    w_cls = scale * jax.random.normal(ks[5], (C, D), jnp.float32)   # PyTorch (out, in)
    b_cls = scale * jax.random.normal(ks[6], (C,), jnp.float32)
    return {
        "embedding": emb,                  # (V, D)
        "w_ih_t": w_ih.T,                  # (D, D)
        "w_hh_t": w_hh.T,                  # (D, D)
        "b_rnn": (b_ih + b_hh)[None, :],   # (1, D)
        "w_cls_t": w_cls.T,                # (D, C)
        "b_cls": b_cls[None, :],           # (1, C)
    }


def prepare_kernel_params(params, use_bf16=False):
    """One-time folding + padding of parameters into kernel-friendly shapes."""
    emb = params["embedding"]
    V, D = emb.shape
    C = params["w_cls_t"].shape[1]
    Vp = _round_up(V, 16)                  # sublane-safe for both f32 and packed bf16
    Cp = _round_up(C, LANE)
    p_dt = jnp.bfloat16 if use_bf16 else jnp.float32

    # Fold embedding gather + input projection + RNN biases into one table (f32, exact).
    emb_pad = jnp.zeros((Vp, D), jnp.float32).at[:V, :].set(emb)
    emb_proj = emb_pad @ params["w_ih_t"] + params["b_rnn"]          # (Vp, D)

    # Pack classifier weight (rows 0..D-1) and bias (row D) into one lane-dense buffer.
    cls_packed = jnp.zeros((D + 1, Cp), jnp.float32)
    cls_packed = cls_packed.at[:D, :C].set(params["w_cls_t"])
    cls_packed = cls_packed.at[D, :C].set(params["b_cls"][0])

    return {
        "emb_proj": emb_proj.astype(p_dt),
        "w_hh_t": params["w_hh_t"].astype(p_dt),
        "cls_packed": cls_packed.astype(p_dt),
    }


@functools.partial(jax.jit, static_argnames=("num_classes",))
def torch_model_forward(x_tokens, kp, num_classes):
    """x_tokens: (B, S) int32. Returns logits (B, num_classes) float32."""
    B, S = x_tokens.shape
    Cp = kp["cls_packed"].shape[1]

    # Pad batch to a sublane multiple; padded rows use token 0 (zero embedding row).
    # The recurrence is a serial latency chain, so throughput scales nearly free with
    # Bp: callers should stack many sequences per call rather than calling per tiny batch.
    Bp = _round_up(max(B, SUBLANE), SUBLANE)
    tok = jnp.zeros((Bp, S), jnp.int32).at[:B, :].set(x_tokens)
    tok_tm = jnp.transpose(tok, (1, 0)).reshape(S * Bp, 1)          # time-major (fused by jit)

    vmem = pl.BlockSpec(memory_space=pltpu.MemorySpace.VMEM)
    # Single ungridded call: all operands (<50 KiB) are VMEM-resident. On v5e/v6e a
    # grid is just a serial loop; a "parallel" batch grid axis only helps on v7x at
    # much larger Bp.
    logits_pad = pl.pallas_call(
        rnn_classify_kernel,
        out_shape=jax.ShapeDtypeStruct((Bp, Cp), jnp.float32),
        in_specs=[vmem] * 4,
        out_specs=vmem,
    )(tok_tm, kp["emb_proj"], kp["w_hh_t"], kp["cls_packed"])
    return logits_pad[:B, :num_classes]


def reference_forward(x_tokens, params):
    """Pure-JAX reference mirroring the PyTorch forward."""
    x = jnp.take(params["embedding"], x_tokens, axis=0)             # (B, S, D)
    B, S, D = x.shape
    h = jnp.zeros((B, D), jnp.float32)
    for t in range(S):
        h = jnp.tanh(x[:, t, :] @ params["w_ih_t"] + h @ params["w_hh_t"]
                     + params["b_rnn"])
    return h @ params["w_cls_t"] + params["b_cls"]


if __name__ == "__main__":
    VOCAB = 30
    VECTOR_DIM = 32
    SENT_LEN = 8
    BATCH = 4

    # bf16 parameters only where the MXU/VPU/EUP have native bf16 (v6e / v7x);
    # v5e (and older) stay all-f32.
    kind = jax.devices()[0].device_kind.lower()
    use_bf16 = any(tag in kind for tag in ("v6", "v7", "7x"))

    key = jax.random.PRNGKey(0)
    k_param, k_tok = jax.random.split(key)
    params = init_params(k_param, VOCAB, VECTOR_DIM, SENT_LEN)
    kparams = prepare_kernel_params(params, use_bf16=use_bf16)
    x_tokens = jax.random.randint(k_tok, (BATCH, SENT_LEN), 0, VOCAB, jnp.int32)

    logits = torch_model_forward(x_tokens, kparams, num_classes=SENT_LEN + 1)
    logits = jax.block_until_ready(logits)

    ref = reference_forward(x_tokens, params)
    tol = 3e-2 if use_bf16 else 1e-4
    assert logits.shape == (BATCH, SENT_LEN + 1)
    assert jnp.allclose(logits, ref, atol=tol, rtol=tol), (
        f"max abs err = {jnp.max(jnp.abs(logits - ref))}")
    print("KERNEL_OK")
</pallas_src>

<mosaic_0001>
module attributes {stable_mosaic.version = 11 : i64} {
  func.func @rnn_classify_kernel(%arg0: memref<64x1xi32, #tpu.memory_space<vmem>>, %arg1: memref<32x32xf32, #tpu.memory_space<vmem>>, %arg2: memref<32x32xf32, #tpu.memory_space<vmem>>, %arg3: memref<33x128xf32, #tpu.memory_space<vmem>>, %arg4: memref<8x128xf32, #tpu.memory_space<vmem>>) attributes {dimension_semantics = [], scalar_prefetch = 0 : i64, scratch_operands = 0 : i64, tpu.core_type = #tpu.core_type<tc>} {
    %c0 = arith.constant 0 : index
    %c0_0 = arith.constant 0 : index
    %0 = vector.load %arg0[%c0, %c0_0] : memref<64x1xi32, #tpu.memory_space<vmem>>, vector<64x1xi32>
    %1 = tpu.iota {dimensions = array<i32: 1>} : vector<64x32xi32>
    %2 = vector.broadcast %0 : vector<64x1xi32> to vector<64x32xi32>
    %3 = arith.cmpi eq, %2, %1 : vector<64x32xi32>
    %4 = arith.extui %3 : vector<64x32xi1> to vector<64x32xi32>
    %5 = arith.sitofp %4 : vector<64x32xi32> to vector<64x32xf32>
    %c0_1 = arith.constant 0 : index
    %c0_2 = arith.constant 0 : index
    %6 = vector.load %arg1[%c0_1, %c0_2] : memref<32x32xf32, #tpu.memory_space<vmem>>, vector<32x32xf32>
    %cst = arith.constant dense<0.000000e+00> : vector<64x32xf32>
    %7 = tpu.matmul %5, %6, %cst {dimension_numbers = #tpu.dot_dimension_numbers<[1], [0], [0], [1], [0, 0, 1, 1], [], []>} : vector<64x32xf32>, vector<32x32xf32>, vector<64x32xf32> -> vector<64x32xf32>
    %c0_3 = arith.constant 0 : index
    %c0_4 = arith.constant 0 : index
    %8 = vector.load %arg2[%c0_3, %c0_4] : memref<32x32xf32, #tpu.memory_space<vmem>>, vector<32x32xf32>
    %9 = vector.extract_strided_slice %7 {offsets = [0, 0], sizes = [8, 32], strides = [1, 1]} : vector<64x32xf32> to vector<8x32xf32>
    %10 = math.tanh %9 : vector<8x32xf32>
    %11 = vector.extract_strided_slice %7 {offsets = [8, 0], sizes = [8, 32], strides = [1, 1]} : vector<64x32xf32> to vector<8x32xf32>
    %cst_5 = arith.constant dense<0.000000e+00> : vector<8x32xf32>
    %12 = tpu.matmul %10, %8, %cst_5 {dimension_numbers = #tpu.dot_dimension_numbers<[1], [0], [0], [1], [0, 0, 1, 1], [], []>} : vector<8x32xf32>, vector<32x32xf32>, vector<8x32xf32> -> vector<8x32xf32>
    %13 = arith.addf %11, %12 : vector<8x32xf32>
    %14 = math.tanh %13 : vector<8x32xf32>
    %15 = vector.extract_strided_slice %7 {offsets = [16, 0], sizes = [8, 32], strides = [1, 1]} : vector<64x32xf32> to vector<8x32xf32>
    %cst_6 = arith.constant dense<0.000000e+00> : vector<8x32xf32>
    %16 = tpu.matmul %14, %8, %cst_6 {dimension_numbers = #tpu.dot_dimension_numbers<[1], [0], [0], [1], [0, 0, 1, 1], [], []>} : vector<8x32xf32>, vector<32x32xf32>, vector<8x32xf32> -> vector<8x32xf32>
    %17 = arith.addf %15, %16 : vector<8x32xf32>
    %18 = math.tanh %17 : vector<8x32xf32>
    %19 = vector.extract_strided_slice %7 {offsets = [24, 0], sizes = [8, 32], strides = [1, 1]} : vector<64x32xf32> to vector<8x32xf32>
    %cst_7 = arith.constant dense<0.000000e+00> : vector<8x32xf32>
    %20 = tpu.matmul %18, %8, %cst_7 {dimension_numbers = #tpu.dot_dimension_numbers<[1], [0], [0], [1], [0, 0, 1, 1], [], []>} : vector<8x32xf32>, vector<32x32xf32>, vector<8x32xf32> -> vector<8x32xf32>
    %21 = arith.addf %19, %20 : vector<8x32xf32>
    %22 = math.tanh %21 : vector<8x32xf32>
    %23 = vector.extract_strided_slice %7 {offsets = [32, 0], sizes = [8, 32], strides = [1, 1]} : vector<64x32xf32> to vector<8x32xf32>
    %cst_8 = arith.constant dense<0.000000e+00> : vector<8x32xf32>
    %24 = tpu.matmul %22, %8, %cst_8 {dimension_numbers = #tpu.dot_dimension_numbers<[1], [0], [0], [1], [0, 0, 1, 1], [], []>} : vector<8x32xf32>, vector<32x32xf32>, vector<8x32xf32> -> vector<8x32xf32>
    %25 = arith.addf %23, %24 : vector<8x32xf32>
    %26 = math.tanh %25 : vector<8x32xf32>
    %27 = vector.extract_strided_slice %7 {offsets = [40, 0], sizes = [8, 32], strides = [1, 1]} : vector<64x32xf32> to vector<8x32xf32>
    %cst_9 = arith.constant dense<0.000000e+00> : vector<8x32xf32>
    %28 = tpu.matmul %26, %8, %cst_9 {dimension_numbers = #tpu.dot_dimension_numbers<[1], [0], [0], [1], [0, 0, 1, 1], [], []>} : vector<8x32xf32>, vector<32x32xf32>, vector<8x32xf32> -> vector<8x32xf32>
    %29 = arith.addf %27, %28 : vector<8x32xf32>
    %30 = math.tanh %29 : vector<8x32xf32>
    %31 = vector.extract_strided_slice %7 {offsets = [48, 0], sizes = [8, 32], strides = [1, 1]} : vector<64x32xf32> to vector<8x32xf32>
    %cst_10 = arith.constant dense<0.000000e+00> : vector<8x32xf32>
    %32 = tpu.matmul %30, %8, %cst_10 {dimension_numbers = #tpu.dot_dimension_numbers<[1], [0], [0], [1], [0, 0, 1, 1], [], []>} : vector<8x32xf32>, vector<32x32xf32>, vector<8x32xf32> -> vector<8x32xf32>
    %33 = arith.addf %31, %32 : vector<8x32xf32>
    %34 = math.tanh %33 : vector<8x32xf32>
    %35 = vector.extract_strided_slice %7 {offsets = [56, 0], sizes = [8, 32], strides = [1, 1]} : vector<64x32xf32> to vector<8x32xf32>
    %cst_11 = arith.constant dense<0.000000e+00> : vector<8x32xf32>
    %36 = tpu.matmul %34, %8, %cst_11 {dimension_numbers = #tpu.dot_dimension_numbers<[1], [0], [0], [1], [0, 0, 1, 1], [], []>} : vector<8x32xf32>, vector<32x32xf32>, vector<8x32xf32> -> vector<8x32xf32>
    %37 = arith.addf %35, %36 : vector<8x32xf32>
    %38 = math.tanh %37 : vector<8x32xf32>
    %c0_12 = arith.constant 0 : index
    %c0_13 = arith.constant 0 : index
    %39 = vector.load %arg3[%c0_12, %c0_13] : memref<33x128xf32, #tpu.memory_space<vmem>>, vector<32x128xf32>
    %c32 = arith.constant 32 : index
    %c0_14 = arith.constant 0 : index
    %40 = vector.load %arg3[%c32, %c0_14] : memref<33x128xf32, #tpu.memory_space<vmem>>, vector<1x128xf32>
    %cst_15 = arith.constant dense<0.000000e+00> : vector<8x128xf32>
    %41 = tpu.matmul %38, %39, %cst_15 {dimension_numbers = #tpu.dot_dimension_numbers<[1], [0], [0], [1], [0, 0, 1, 1], [], []>} : vector<8x32xf32>, vector<32x128xf32>, vector<8x128xf32> -> vector<8x128xf32>
    %42 = vector.broadcast %40 : vector<1x128xf32> to vector<8x128xf32>
    %43 = arith.addf %41, %42 : vector<8x128xf32>
    %c0_16 = arith.constant 0 : index
    %c0_17 = arith.constant 0 : index
    %44 = vector.load %arg4[%c0_16, %c0_17] : memref<8x128xf32, #tpu.memory_space<vmem>>, vector<8x128xf32>
    tpu.vector_store %arg4[%c0_16, %c0_17], %43 {strides = array<i32>} : memref<8x128xf32, #tpu.memory_space<vmem>>, vector<8x128xf32>,
    return
  }
}

</mosaic_0001>

<bundles_post_ra>
// kernel: torch_model_forward.1
= control target key start
LH: loop header
LB: loop body
LE: loop exit
PB: predicated region body
PF: predicated region fallthrough
CT: control target
= control target key end

     0   :  { %9 = vsyncpa [#allocation3], 0  ;;  %s463_s18 = smov [#allocation2]   ;;  %s464_s20 = smov 128   ;;  %s566_s0 = inlined_call_operand.vmem [shape: s32[64,1], index: 0, kind: input, shape index: {}]   ;;  %s567_s1 = inlined_call_operand.vmem [shape: f32[32,32], index: 1, kind: input, shape index: {}]   ;;  %s568_s2 = inlined_call_operand.hbm [shape: f32[32,32], index: 2, kind: input, shape index: {}]   ;;  %s569_s3 = inlined_call_operand.vmem [shape: f32[33,128], index: 3, kind: input, shape index: {}]   ;;  %s570_s4 = inlined_call_operand.vmem [shape: f32[8,128], index: 4, kind: output, shape index: {}]  }
   0x1   :  { %s18_s17 = sshll.u32 %s568_s2, 4  ;;  %s20_s19 = sshll.u32 %s463_s18, 4  ;;  %s19_s17 = int_to_ptr.hbm [resolvable:$true] %s18_s17  ;;  %s21_s19 = int_to_ptr.vmem [resolvable:$true] %s20_s19 }
   0x2   :  { %s465_s21 = smov 8  }
   0x3   :  { %26 = dma.hbm_to_vmem [thread:$0]  %s19_s17, 512, %s21_s19, [#allocation3], %s464_s20, %s464_s20, %s465_s21  }
   0x4   :  { %461 = dma.done.wait [#allocation3], 512  }
   0x5   :  { %462 = vsyncadd [#allocation3], 4294966784  ;;  %v466_v0 = vmov 0   ;;  %v33_v1 = vld [vmem:[%s566_s0] sm:$0xff]  ;;  %v35_v2 = vld [vmem:[%s566_s0 + $0x10] sm:$0xff]  ;;  %v41_v13 = vlaneseq  ;;  %vm95_vm1 = vcmask 261120  }
   0x6   :  { %417 = vset.pattern.permute.xlu0 %v466_v0  ;;  %419 = vset.pattern.permute.xlu2 %v466_v0  ;;  %v94_v3 = vld [vmem:[%s567_s1 + $0x18] sm:$0xff]  ;;  %v93_v4 = vld [vmem:[%s567_s1 + $0x10] sm:$0xff]  ;;  %v92_v5 = vld [vmem:[%s567_s1 + $0x8] sm:$0xff]  ;;  %v467_v17 = vmov 0.0  }
   0x7   :  { %418 = vset.pattern.permute.xlu1 %v466_v0  ;;  %44 = vperm.xlu0 %417, %v33_v1   ;;  %v37_v6 = vld [vmem:[%s566_s0 + $0x20] sm:$0xff]  ;;  %v39_v7 = vld [vmem:[%s566_s0 + $0x30] sm:$0xff]  ;;  %v40_v8 = vld [vmem:[%s566_s0 + $0x38] sm:$0xff]  ;;  %v42_v14 = vand.u32 127, %v41_v13 }
   0x8   :  { %50 = vperm.xlu2 %419, %v35_v2   ;;  %132 = vmatpush.msra.mxu0 %v94_v3  ;;  %v91_v9 = vld [vmem:[%s567_s1] sm:$0xff]  ;;  %v34_v10 = vld [vmem:[%s566_s0 + $0x8] sm:$0xff]  ;;  %v36_v16 = vld [vmem:[%s566_s0 + $0x18] sm:$0xff] }
   0x9   :  { %400 = vmatpush.msra.mxu1 %v94_v3  ;;  %402 = vmatpush.msra.mxu3 %v94_v3  ;;  %v38_v12 = vld [vmem:[%s566_s0 + $0x28] sm:$0xff]  ;;  %v164_v30 = vld [vmem:[#allocation2 + $0x18] sm:$0xff]  ;;  %v163_v31 = vld [vmem:[#allocation2 + $0x10] sm:$0xff] }
   0xa   :  { %133 = vmatpush.msra.mxu0 %v93_v4  ;;  %401 = vmatpush.msra.mxu2 %v94_v3  ;;  %v162_v32 = vld [vmem:[#allocation2 + $0x8] sm:$0xff]  ;;  %v161_v33 = vld [vmem:[#allocation2] sm:$0xff]  ;;  %v344_v63 = vld [vmem:[%s569_s3 + $0x18] sm:$0xff] }
   0xb   :  { %403 = vmatpush.msra.mxu1 %v93_v4  ;;  %405 = vmatpush.msra.mxu3 %v93_v4  ;;  %v343_v0 = vld [vmem:[%s569_s3 + $0x10] sm:$0xff]  ;;  %v342_v1 = vld [vmem:[%s569_s3 + $0x8] sm:$0xff]  ;;  %v341_v2 = vld [vmem:[%s569_s3] sm:$0xff] }
   0xc   :  { %134 = vmatpush.msra.mxu0 %v92_v5  ;;  %404 = vmatpush.msra.mxu2 %v93_v4 }
   0xd   :  { %406 = vmatpush.msra.mxu1 %v92_v5  ;;  %408 = vmatpush.msra.mxu3 %v92_v5 }
   0xe   :  { %407 = vmatpush.msra.mxu2 %v92_v5  ;;  %135 = vmatpush.msra.mxu0 %v91_v9 }
   0xf   :  { %56 = vperm.xlu0 %417, %v37_v6   ;;  %409 = vmatpush.msra.mxu1 %v91_v9  ;;  %v420_v6 = vld [vmem:[%s569_s3 + $0x20] ss:$0 sm:$0xff] }
  0x10   :  { %62 = vperm.xlu2 %419, %v39_v7   ;;  %47 = vperm.xlu1 %418, %v34_v10  }
  0x11   :  { %411 = vmatpush.msra.mxu3 %v91_v9  ;;  %410 = vmatpush.msra.mxu2 %v91_v9 }
  0x12   :  { %181 = vmatpush.msrb.mxu1 %v164_v30 }
  0x13   :  { %206 = vmatpush.msrb.mxu2 %v164_v30  ;;  %231 = vmatpush.msrb.mxu3 %v164_v30 }
  0x14   :  { %182 = vmatpush.msrb.mxu1 %v163_v31 }
  0x15   :  { %207 = vmatpush.msrb.mxu2 %v163_v31  ;;  %232 = vmatpush.msrb.mxu3 %v163_v31 }
  0x16   :  { %183 = vmatpush.msrb.mxu1 %v162_v32 }
  0x17   :  { %65 = vperm.xlu0 %417, %v40_v8   ;;  %208 = vmatpush.msrb.mxu2 %v162_v32 }
  0x18   :  { %59 = vperm.xlu1 %418, %v38_v12   ;;  %233 = vmatpush.msrb.mxu3 %v162_v32 }
  0x19   :  { %184 = vmatpush.msrb.mxu1 %v161_v33  ;;  %209 = vmatpush.msrb.mxu2 %v161_v33 }
  0x1a   :  { %234 = vmatpush.msrb.mxu3 %v161_v33 }
  0x20   :  { %53 = vperm.xlu1 %418, %v36_v16  }
  0x62   :  { %v51_v11 = vpop.permute.xlu2 %50 }
  0x63   :  { %vm69_vm6 = vcmp.eq.s32.totalorder %v51_v11, %v42_v14 }
  0x64   :  { %v378_v27 = vsel %vm69_vm6, 1.0, %v467_v17 }
  0x6a   :  { %v63_v15 = vpop.permute.xlu2 %62 }
  0x6b   :  { %vm73_vm0 = vcmp.eq.s32.totalorder %v63_v15, %v42_v14 }
  0x6c   :  { %v382_v18 = vsel %vm73_vm0, 1.0, %v467_v17 }
  0x6d   :  { %390 = vmatmul.msk.f32.vlgmr.msra.gmra.mxu3 %vm95_vm1, %v382_v18 }
  0x6e   :  { %306 = vmatpush.msra.mxu3 %v164_v30 }
  0x70   :  { %307 = vmatpush.msra.mxu3 %v163_v31 }
  0x72   :  { %308 = vmatpush.msra.mxu3 %v162_v32 }
  0x74   :  { %309 = vmatpush.msra.mxu3 %v161_v33 }
  0x79   :  { %v45_v19 = vpop.permute.xlu0 %44 }
  0x7a   :  { %vm67_vm2 = vcmp.eq.s32.totalorder %v45_v19, %v42_v14 }
  0x7b   :  { %v376_v20 = vsel %vm67_vm2, 1.0, %v467_v17 }
  0x7c   :  { %384 = vmatmul.msk.f32.vlgmr.msra.gmra.mxu0 %vm95_vm1, %v376_v20 }
  0x81   :  { %v57_v21 = vpop.permute.xlu0 %56 }
  0x82   :  { %vm71_vm3 = vcmp.eq.s32.totalorder %v57_v21, %v42_v14  ;;  %v48_v25 = vpop.permute.xlu1 %47 }
  0x83   :  { %v380_v22 = vsel %vm71_vm3, 1.0, %v467_v17  ;;  %vm68_vm5 = vcmp.eq.s32.totalorder %v48_v25, %v42_v14 }
  0x84   :  { %388 = vmatmul.msk.f32.vlgmr.msra.gmra.mxu1 %vm95_vm1, %v380_v22  ;;  %v377_v26 = vsel %vm68_vm5, 1.0, %v467_v17 }
  0x85   :  { %385 = vmatmul.msk.f32.gmra.mxu0 %vm95_vm1, %v377_v26  ;;  %256 = vmatpush.msra.mxu1 %v164_v30 }
  0x87   :  { %257 = vmatpush.msra.mxu1 %v163_v31 }
  0x89   :  { %v66_v23 = vpop.permute.xlu0 %65  ;;  %258 = vmatpush.msra.mxu1 %v162_v32 }
  0x8a   :  { %vm74_vm4 = vcmp.eq.s32.totalorder %v66_v23, %v42_v14  ;;  %v60_v28 = vpop.permute.xlu1 %59 }
  0x8b   :  { %v383_v24 = vsel %vm74_vm4, 1.0, %v467_v17  ;;  %vm72_vm7 = vcmp.eq.s32.totalorder %v60_v28, %v42_v14  ;;  %259 = vmatpush.msra.mxu1 %v161_v33 }
  0x8c   :  { %391 = vmatmul.msk.f32.gmra.mxu3 %vm95_vm1, %v383_v24  ;;  %v381_v29 = vsel %vm72_vm7, 1.0, %v467_v17 }
  0x8d   :  { %386 = vmatmul.msk.f32.gmra.mxu0 %vm95_vm1, %v378_v27  ;;  %389 = vmatmul.msk.f32.vlgmr.msra.gmra.mxu2 %vm95_vm1, %v381_v29 }
  0x8e   :  { %281 = vmatpush.msra.mxu2 %v164_v30 }
  0x90   :  { %282 = vmatpush.msra.mxu2 %v163_v31 }
  0x92   :  { %v54_v34 = vpop.permute.xlu1 %53  ;;  %283 = vmatpush.msra.mxu2 %v162_v32 }
  0x93   :  { %vm70_vm8 = vcmp.eq.s32.totalorder %v54_v34, %v42_v14 }
  0x94   :  { %v379_v35 = vsel %vm70_vm8, 1.0, %v467_v17  ;;  %284 = vmatpush.msra.mxu2 %v161_v33 }
  0x95   :  { %387 = vmatmul.msk.f32.gmra.mxu0 %vm95_vm1, %v379_v35 }
  0xf0   :  { %v155_v48 = vpop.f32.mrf.mxu3 }
  0xf9   :  { %v137_v36 = vpop.f32.mrf.mxu0 }
  0xfa   :  { %421 = vtanh.f32 %v137_v36 }
 0x100   :  { %v422_v37 = vpop.eup %421 }
 0x101   :  { %392 = vmatmul.msk.f32.vlgmr.msrb.gmra.mxu1 %vm95_vm1, %v422_v37  ;;  %v149_v38 = vpop.f32.mrf.mxu1 }
 0x102   :  { %331 = vmatpush.msrb.mxu1 %v164_v30  ;;  %v140_v39 = vpop.f32.mrf.mxu0 }
 0x104   :  { %332 = vmatpush.msrb.mxu1 %v163_v31 }
 0x106   :  { %333 = vmatpush.msrb.mxu1 %v162_v32 }
 0x108   :  { %334 = vmatpush.msrb.mxu1 %v161_v33 }
 0x10a   :  { %v143_v44 = vpop.f32.mrf.mxu0 }
 0x10f   :  { %v158_v49 = vpop.f32.mrf.mxu3 }
 0x110   :  { %v152_v43 = vpop.f32.mrf.mxu2 }
 0x112   :  { %v146_v50 = vpop.f32.mrf.mxu0 }
 0x17e   :  { %v186_v40 = vpop.f32.mrf.mxu1 }
 0x17f   :  { %v189_v41 = vadd.f32 %v186_v40, %v140_v39 }
 0x181   :  { %423 = vtanh.f32 %v189_v41 }
 0x187   :  { %v424_v42 = vpop.eup %423 }
 0x188   :  { %393 = vmatmul.msk.f32.vlgmr.msrb.gmra.mxu2 %vm95_vm1, %v424_v42 }
 0x189   :  { %362 = vmatpush.msrb.mxu2 %v344_v63 }
 0x18b   :  { %363 = vmatpush.msrb.mxu2 %v343_v0 }
 0x18d   :  { %364 = vmatpush.msrb.mxu2 %v342_v1 }
 0x18f   :  { %365 = vmatpush.msrb.mxu2 %v341_v2 }
 0x20b   :  { %v211_v45 = vpop.f32.mrf.mxu2 }
 0x20c   :  { %v214_v46 = vadd.f32 %v211_v45, %v143_v44 }
 0x20e   :  { %425 = vtanh.f32 %v214_v46 }
 0x214   :  { %v426_v47 = vpop.eup %425 }
 0x215   :  { %394 = vmatmul.msk.f32.vlgmr.msrb.gmra.mxu3 %vm95_vm1, %v426_v47 }
 0x298   :  { %v236_v51 = vpop.f32.mrf.mxu3 }
 0x299   :  { %v239_v52 = vadd.f32 %v236_v51, %v146_v50 }
 0x29b   :  { %427 = vtanh.f32 %v239_v52 }
 0x2a1   :  { %v428_v53 = vpop.eup %427 }
 0x2a2   :  { %395 = vmatmul.msk.f32.vlgmr.msra.gmra.mxu1 %vm95_vm1, %v428_v53 }
 0x31f   :  { %v261_v54 = vpop.f32.mrf.mxu1 }
 0x320   :  { %v264_v55 = vadd.f32 %v261_v54, %v149_v38 }
 0x322   :  { %429 = vtanh.f32 %v264_v55 }
 0x328   :  { %v430_v56 = vpop.eup %429 }
 0x329   :  { %396 = vmatmul.msk.f32.vlgmr.msra.gmra.mxu2 %vm95_vm1, %v430_v56 }
 0x3ac   :  { %v286_v57 = vpop.f32.mrf.mxu2 }
 0x3ad   :  { %v289_v58 = vadd.f32 %v286_v57, %v152_v43 }
 0x3af   :  { %431 = vtanh.f32 %v289_v58 }
 0x3b5   :  { %v432_v59 = vpop.eup %431 }
 0x3b6   :  { %397 = vmatmul.msk.f32.vlgmr.msra.gmra.mxu3 %vm95_vm1, %v432_v59 }
 0x439   :  { %v311_v60 = vpop.f32.mrf.mxu3 }
 0x43a   :  { %v314_v61 = vadd.f32 %v311_v60, %v155_v48 }
 0x43c   :  { %433 = vtanh.f32 %v314_v61 }
 0x442   :  { %v434_v62 = vpop.eup %433 }
 0x443   :  { %398 = vmatmul.msk.f32.vlgmr.msrb.gmra.mxu1 %vm95_vm1, %v434_v62 }
 0x4c0   :  { %v336_v3 = vpop.f32.mrf.mxu1 }
 0x4c1   :  { %v339_v4 = vadd.f32 %v336_v3, %v158_v49 }
 0x4c3   :  { %435 = vtanh.f32 %v339_v4 }
 0x4c9   :  { %v436_v5 = vpop.eup %435 }
 0x4ca   :  { %399 = vmatmul.msk.f32.vlgmr.msrb.gmra.mxu2 %vm95_vm1, %v436_v5 }
 0x54d   :  { %v367_v7 = vpop.f32.mrf.mxu2 }
 0x54e   :  { %v368_v8 = vadd.f32 %v420_v6, %v367_v7 }
 0x550   :  { %370 = vst [vmem:[%s570_s4] sm:$0xff] %v368_v8 }
 0x551   :  { %375 = vsyncpa [#allocation3], 1 }

</bundles_post_ra>
